<compile_context>
chip_gen: v6e
topology: v6e:2x2x1
jax: 0.10.0
libtpu: 0.0.40
codegen_flags: <defaults>
</compile_context>

<pallas_src>
import functools

import numpy as np
import jax
import jax.numpy as jnp
from jax.experimental import pallas as pl
from jax.experimental.pallas import tpu as pltpu

TIME_STEP = 0.1  # opt['time_step']


def gnn_kernel(x0_ref, d_ref, w_ref, b_ref, o_ref, *, mesh_m, num_layers):
    """Whole forward pass in one invocation (no grid).

    x0_ref : [H, N]    f32  encoded node state x0 = pad(features)^T (lanes = nodes)
    d_ref  : [8, N]    f32  row 0: D^{-1/2}; rows 1..4: D^{-1/2} masked per
                            direction (east/west/south/north neighbor exists)
    w_ref  : [L, H, H] bf16 per-layer Theta^T (pre-transposed for [H, N] layout)
    b_ref  : [L, H, 1] f32  per-layer GCN bias (zero here, kept for generality)
    o_ref  : [H, N]    f32  final node state
    """
    H, N = o_ref.shape
    m = mesh_m

    x = x0_ref[...]                       # f32 [H, N]
    d_all = d_ref[0:1, :]                 # [1, N] broadcasts over feature rows
    d_e = d_ref[1:2, :]
    d_w = d_ref[2:3, :]
    d_s = d_ref[3:4, :]
    d_n = d_ref[4:5, :]

    for l in range(num_layers):           # static unroll, L = 2
        # GCNConv linear part: (X Theta)^T = Theta^T X  (bf16 operands, f32 acc)
        xw = jnp.dot(w_ref[l], x.astype(jnp.bfloat16),
                     preferred_element_type=jnp.float32)          # [H, N]

        # Symmetric-normalized aggregation A_hat @ (X Theta) with
        # A_hat = D^-1/2 (A+I) D^-1/2, written as the exact 5-point stencil
        #   agg_i = d_i * ( d_i xw_i + sum_{j in N(i)} d_j xw_j ).
        # Source scale once, rotate along the lane axis (XLU), receiver-side
        # direction-masked scale (precomputed rows of d_ref).
        s = xw * d_all                                            # d_j * xw_j
        agg = s * d_all                                           # self-loop term
        agg = agg + pltpu.roll(s, shift=N - 1, axis=1) * d_e      # s[i+1]
        agg = agg + pltpu.roll(s, shift=1, axis=1) * d_w          # s[i-1]
        agg = agg + pltpu.roll(s, shift=N - m, axis=1) * d_s      # s[i+m]
        agg = agg + pltpu.roll(s, shift=m, axis=1) * d_n          # s[i-m]

        # bias + ReLU (dropout p=0.0 is a no-op in eval), residual Euler step.
        res = jnp.maximum(agg + b_ref[l], 0.0)
        x = x + TIME_STEP * res

    o_ref[...] = x


def gnn_forward(features, d_pack, w_stack, b_stack, hidden_dim, mesh_m, dim):
    """features: [N, F]; d_pack: [8, N]; w_stack: [L, H, H]; b_stack: [L, 1, H]."""
    N, F = features.shape
    H = hidden_dim
    L = w_stack.shape[0]

    # enc = 'identity' (frozen zero-pad linear): x0 = [features | 0], stored as [H, N].
    x0_t = jnp.zeros((H, N), jnp.float32).at[:F, :].set(features.T.astype(jnp.float32))
    w_t = jnp.transpose(w_stack, (0, 2, 1)).astype(jnp.bfloat16)   # Theta^T per layer
    b_t = jnp.transpose(b_stack, (0, 2, 1)).astype(jnp.float32)    # [L, H, 1]

    kernel = functools.partial(gnn_kernel, mesh_m=mesh_m, num_layers=L)
    x_t = pl.pallas_call(
        kernel,
        out_shape=jax.ShapeDtypeStruct((H, N), jnp.float32),
        in_specs=[pl.BlockSpec(memory_space=pltpu.MemorySpace.VMEM)] * 4,
        out_specs=pl.BlockSpec(memory_space=pltpu.MemorySpace.VMEM),
    )(x0_t, d_pack, w_t, b_t)

    # dec = Identity; loss_type = 'mesh_loss' -> x_phys = x[:, :dim]
    return x_t[:dim, :].T


def ref_forward(features, a_hat, w_stack, b_stack, hidden_dim, dim):
    """Pure-JAX f32 reference of the same forward pass (dense normalized adjacency)."""
    N, F = features.shape
    x = jnp.zeros((N, hidden_dim), jnp.float32).at[:, :F].set(features)
    for l in range(w_stack.shape[0]):
        res = a_hat @ (x @ w_stack[l]) + b_stack[l]
        res = jnp.maximum(res, 0.0)
        x = x + TIME_STEP * res
    return x[:, :dim]


def build_grid_graph(m):
    """4-neighbour grid graph on an m x m mesh: returns (dense A_hat, packed D^{-1/2} rows)."""
    n = m * m
    idx = np.arange(n).reshape(m, m)
    A = np.zeros((n, n), dtype=np.float32)
    for i in range(m):
        for j in range(m):
            if i + 1 < m:
                A[idx[i, j], idx[i + 1, j]] = 1.0
                A[idx[i + 1, j], idx[i, j]] = 1.0
            if j + 1 < m:
                A[idx[i, j], idx[i, j + 1]] = 1.0
                A[idx[i, j + 1], idx[i, j]] = 1.0
    A = A + np.eye(n, dtype=np.float32)          # GCN normalization adds self loops
    deg = A.sum(axis=1)
    d_inv_sqrt = (1.0 / np.sqrt(deg)).astype(np.float32)
    a_hat = (d_inv_sqrt[:, None] * A * d_inv_sqrt[None, :]).astype(np.float32)

    # Packed per-direction receiver scales for the stencil kernel.
    col = np.arange(n) % m
    row = np.arange(n) // m
    has_e = (col < m - 1).astype(np.float32)     # east  neighbor i+1 exists
    has_w = (col > 0).astype(np.float32)         # west  neighbor i-1 exists
    has_s = (row < m - 1).astype(np.float32)     # south neighbor i+m exists
    has_n = (row > 0).astype(np.float32)         # north neighbor i-m exists
    d_pack = np.zeros((8, n), dtype=np.float32)  # 8 sublanes for clean layout
    d_pack[0] = d_inv_sqrt
    d_pack[1] = d_inv_sqrt * has_e
    d_pack[2] = d_inv_sqrt * has_w
    d_pack[3] = d_inv_sqrt * has_s
    d_pack[4] = d_inv_sqrt * has_n
    return a_hat, d_pack


if __name__ == "__main__":
    # --- small deterministic setup -------------------------------------------
    mesh_m = 16            # 16x16 mesh -> N = 256 nodes (lane-aligned: 2 x 128)
    N = mesh_m * mesh_m
    dim = 2                # dataset.num_x_comp_features
    hidden_dim = 32        # opt['hidden_dim']
    num_layers = 2         # opt['num_layers']
    in_dim = dim + 1 + 1   # x_comp + f + uu  (gnn_inc_feat_f / gnn_inc_feat_uu)

    key = jax.random.PRNGKey(0)
    k_f, k_uu, *k_w = jax.random.split(key, 2 + num_layers)

    # node inputs (data.x_comp, data.f_tensor, data.uu_tensor), single batch
    lin = np.linspace(0.0, 1.0, mesh_m, dtype=np.float32)
    X, Y = np.meshgrid(lin, lin, indexing="ij")
    x_comp = jnp.asarray(np.stack([X.ravel(), Y.ravel()], axis=1))   # [N, 2]
    f = jax.random.normal(k_f, (N,), dtype=jnp.float32)              # [N]
    uu = jax.random.normal(k_uu, (N,), dtype=jnp.float32)            # [N]

    # features = cat([x_comp, f[:,None], uu[:,None]], dim=1)  (gnn_normalize=False)
    features = jnp.concatenate([x_comp, f[:, None], uu[:, None]], axis=1)  # [N, 4]

    # GCN layer parameters (glorot-uniform weights, zero bias, as in GCNConv init)
    limit = float(np.sqrt(6.0 / (hidden_dim + hidden_dim)))
    w_stack = jnp.stack(
        [
            jax.random.uniform(
                k_w[i], (hidden_dim, hidden_dim), jnp.float32, -limit, limit
            )
            for i in range(num_layers)
        ]
    )                                                               # [L, H, H]
    b_stack = jnp.zeros((num_layers, 1, hidden_dim), jnp.float32)   # [L, 1, H]

    # graph "glue": packed degree-normalization rows for the kernel, dense A_hat for ref
    a_hat_np, d_pack_np = build_grid_graph(mesh_m)
    a_hat = jnp.asarray(a_hat_np)                                   # [N, N] (ref only)
    d_pack = jnp.asarray(d_pack_np)                                 # [8, N]

    # --- run -------------------------------------------------------------------
    x_phys = gnn_forward(features, d_pack, w_stack, b_stack,
                         hidden_dim, mesh_m, dim)
    x_phys = jax.block_until_ready(x_phys)

    x_ref = ref_forward(features, a_hat, w_stack, b_stack, hidden_dim, dim)
    assert x_phys.shape == (N, dim)
    # bf16 MXU operands (f32 accumulation) -> slightly looser tolerance than pure f32.
    np.testing.assert_allclose(np.asarray(x_phys), np.asarray(x_ref),
                               rtol=2e-2, atol=2e-2)

    print("KERNEL_OK")
</pallas_src>

<mosaic_0001>
module attributes {stable_mosaic.version = 11 : i64} {
  func.func @gnn_kernel(%arg0: memref<32x256xf32, #tpu.memory_space<vmem>>, %arg1: memref<8x256xf32, #tpu.memory_space<vmem>>, %arg2: memref<2x32x32xbf16, #tpu.memory_space<vmem>>, %arg3: memref<2x32x1xf32, #tpu.memory_space<vmem>>, %arg4: memref<32x256xf32, #tpu.memory_space<vmem>>) attributes {dimension_semantics = [], scalar_prefetch = 0 : i64, scratch_operands = 0 : i64, tpu.core_type = #tpu.core_type<tc>} {
    %c0 = arith.constant 0 : index
    %c0_0 = arith.constant 0 : index
    %0 = vector.load %arg0[%c0, %c0_0] : memref<32x256xf32, #tpu.memory_space<vmem>>, vector<32x256xf32>
    %c0_1 = arith.constant 0 : index
    %c0_2 = arith.constant 0 : index
    %1 = vector.load %arg1[%c0_1, %c0_2] : memref<8x256xf32, #tpu.memory_space<vmem>>, vector<1x256xf32>
    %c1 = arith.constant 1 : index
    %c0_3 = arith.constant 0 : index
    %2 = vector.load %arg1[%c1, %c0_3] : memref<8x256xf32, #tpu.memory_space<vmem>>, vector<1x256xf32>
    %c2 = arith.constant 2 : index
    %c0_4 = arith.constant 0 : index
    %3 = vector.load %arg1[%c2, %c0_4] : memref<8x256xf32, #tpu.memory_space<vmem>>, vector<1x256xf32>
    %c3 = arith.constant 3 : index
    %c0_5 = arith.constant 0 : index
    %4 = vector.load %arg1[%c3, %c0_5] : memref<8x256xf32, #tpu.memory_space<vmem>>, vector<1x256xf32>
    %c4 = arith.constant 4 : index
    %c0_6 = arith.constant 0 : index
    %5 = vector.load %arg1[%c4, %c0_6] : memref<8x256xf32, #tpu.memory_space<vmem>>, vector<1x256xf32>
    %c0_7 = arith.constant 0 : index
    %c0_8 = arith.constant 0 : index
    %c0_9 = arith.constant 0 : index
    %6 = vector.load %arg2[%c0_7, %c0_8, %c0_9] : memref<2x32x32xbf16, #tpu.memory_space<vmem>>, vector<1x32x32xbf16>
    %7 = vector.shape_cast %6 : vector<1x32x32xbf16> to vector<32x32xbf16>
    %8 = arith.truncf %0 : vector<32x256xf32> to vector<32x256xbf16>
    %cst = arith.constant dense<0.000000e+00> : vector<32x256xf32>
    %9 = tpu.matmul %7, %8, %cst {dimension_numbers = #tpu.dot_dimension_numbers<[1], [0], [0], [1], [0, 0, 1, 1], [], []>} : vector<32x32xbf16>, vector<32x256xbf16>, vector<32x256xf32> -> vector<32x256xf32>
    %10 = vector.broadcast %1 : vector<1x256xf32> to vector<32x256xf32>
    %11 = arith.mulf %9, %10 : vector<32x256xf32>
    %12 = vector.broadcast %1 : vector<1x256xf32> to vector<32x256xf32>
    %13 = arith.mulf %11, %12 : vector<32x256xf32>
    %c255_i32 = arith.constant 255 : i32
    %14 = tpu.dynamic_rotate %11 by %c255_i32 dim 1 : vector<32x256xf32>, i32 -> vector<32x256xf32>
    %15 = vector.broadcast %2 : vector<1x256xf32> to vector<32x256xf32>
    %16 = arith.mulf %14, %15 : vector<32x256xf32>
    %17 = arith.addf %13, %16 : vector<32x256xf32>
    %c1_i32 = arith.constant 1 : i32
    %18 = tpu.dynamic_rotate %11 by %c1_i32 dim 1 : vector<32x256xf32>, i32 -> vector<32x256xf32>
    %19 = vector.broadcast %3 : vector<1x256xf32> to vector<32x256xf32>
    %20 = arith.mulf %18, %19 : vector<32x256xf32>
    %21 = arith.addf %17, %20 : vector<32x256xf32>
    %c240_i32 = arith.constant 240 : i32
    %22 = tpu.dynamic_rotate %11 by %c240_i32 dim 1 : vector<32x256xf32>, i32 -> vector<32x256xf32>
    %23 = vector.broadcast %4 : vector<1x256xf32> to vector<32x256xf32>
    %24 = arith.mulf %22, %23 : vector<32x256xf32>
    %25 = arith.addf %21, %24 : vector<32x256xf32>
    %c16_i32 = arith.constant 16 : i32
    %26 = tpu.dynamic_rotate %11 by %c16_i32 dim 1 : vector<32x256xf32>, i32 -> vector<32x256xf32>
    %27 = vector.broadcast %5 : vector<1x256xf32> to vector<32x256xf32>
    %28 = arith.mulf %26, %27 : vector<32x256xf32>
    %29 = arith.addf %25, %28 : vector<32x256xf32>
    %c0_10 = arith.constant 0 : index
    %c0_11 = arith.constant 0 : index
    %c0_12 = arith.constant 0 : index
    %30 = vector.load %arg3[%c0_10, %c0_11, %c0_12] : memref<2x32x1xf32, #tpu.memory_space<vmem>>, vector<1x32x1xf32>
    %31 = vector.shape_cast %30 : vector<1x32x1xf32> to vector<32x1xf32>
    %32 = vector.broadcast %31 : vector<32x1xf32> to vector<32x256xf32>
    %33 = arith.addf %29, %32 : vector<32x256xf32>
    %cst_13 = arith.constant 0.000000e+00 : f32
    %34 = vector.broadcast %cst_13 : f32 to vector<32x256xf32>
    %35 = arith.maximumf %33, %34 : vector<32x256xf32>
    %cst_14 = arith.constant 1.000000e-01 : f32
    %36 = vector.broadcast %cst_14 : f32 to vector<32x256xf32>
    %37 = arith.mulf %36, %35 : vector<32x256xf32>
    %38 = arith.addf %0, %37 : vector<32x256xf32>
    %c1_15 = arith.constant 1 : index
    %c0_16 = arith.constant 0 : index
    %c0_17 = arith.constant 0 : index
    %39 = vector.load %arg2[%c1_15, %c0_16, %c0_17] : memref<2x32x32xbf16, #tpu.memory_space<vmem>>, vector<1x32x32xbf16>
    %40 = vector.shape_cast %39 : vector<1x32x32xbf16> to vector<32x32xbf16>
    %41 = arith.truncf %38 : vector<32x256xf32> to vector<32x256xbf16>
    %cst_18 = arith.constant dense<0.000000e+00> : vector<32x256xf32>
    %42 = tpu.matmul %40, %41, %cst_18 {dimension_numbers = #tpu.dot_dimension_numbers<[1], [0], [0], [1], [0, 0, 1, 1], [], []>} : vector<32x32xbf16>, vector<32x256xbf16>, vector<32x256xf32> -> vector<32x256xf32>
    %43 = vector.broadcast %1 : vector<1x256xf32> to vector<32x256xf32>
    %44 = arith.mulf %42, %43 : vector<32x256xf32>
    %45 = vector.broadcast %1 : vector<1x256xf32> to vector<32x256xf32>
    %46 = arith.mulf %44, %45 : vector<32x256xf32>
    %c255_i32_19 = arith.constant 255 : i32
    %47 = tpu.dynamic_rotate %44 by %c255_i32_19 dim 1 : vector<32x256xf32>, i32 -> vector<32x256xf32>
    %48 = vector.broadcast %2 : vector<1x256xf32> to vector<32x256xf32>
    %49 = arith.mulf %47, %48 : vector<32x256xf32>
    %50 = arith.addf %46, %49 : vector<32x256xf32>
    %c1_i32_20 = arith.constant 1 : i32
    %51 = tpu.dynamic_rotate %44 by %c1_i32_20 dim 1 : vector<32x256xf32>, i32 -> vector<32x256xf32>
    %52 = vector.broadcast %3 : vector<1x256xf32> to vector<32x256xf32>
    %53 = arith.mulf %51, %52 : vector<32x256xf32>
    %54 = arith.addf %50, %53 : vector<32x256xf32>
    %c240_i32_21 = arith.constant 240 : i32
    %55 = tpu.dynamic_rotate %44 by %c240_i32_21 dim 1 : vector<32x256xf32>, i32 -> vector<32x256xf32>
    %56 = vector.broadcast %4 : vector<1x256xf32> to vector<32x256xf32>
    %57 = arith.mulf %55, %56 : vector<32x256xf32>
    %58 = arith.addf %54, %57 : vector<32x256xf32>
    %c16_i32_22 = arith.constant 16 : i32
    %59 = tpu.dynamic_rotate %44 by %c16_i32_22 dim 1 : vector<32x256xf32>, i32 -> vector<32x256xf32>
    %60 = vector.broadcast %5 : vector<1x256xf32> to vector<32x256xf32>
    %61 = arith.mulf %59, %60 : vector<32x256xf32>
    %62 = arith.addf %58, %61 : vector<32x256xf32>
    %c1_23 = arith.constant 1 : index
    %c0_24 = arith.constant 0 : index
    %c0_25 = arith.constant 0 : index
    %63 = vector.load %arg3[%c1_23, %c0_24, %c0_25] : memref<2x32x1xf32, #tpu.memory_space<vmem>>, vector<1x32x1xf32>
    %64 = vector.shape_cast %63 : vector<1x32x1xf32> to vector<32x1xf32>
    %65 = vector.broadcast %64 : vector<32x1xf32> to vector<32x256xf32>
    %66 = arith.addf %62, %65 : vector<32x256xf32>
    %cst_26 = arith.constant 0.000000e+00 : f32
    %67 = vector.broadcast %cst_26 : f32 to vector<32x256xf32>
    %68 = arith.maximumf %66, %67 : vector<32x256xf32>
    %cst_27 = arith.constant 1.000000e-01 : f32
    %69 = vector.broadcast %cst_27 : f32 to vector<32x256xf32>
    %70 = arith.mulf %69, %68 : vector<32x256xf32>
    %71 = arith.addf %38, %70 : vector<32x256xf32>
    %c0_28 = arith.constant 0 : index
    %c0_29 = arith.constant 0 : index
    %72 = vector.load %arg4[%c0_28, %c0_29] : memref<32x256xf32, #tpu.memory_space<vmem>>, vector<32x256xf32>
    tpu.vector_store %arg4[%c0_28, %c0_29], %71 {strides = array<i32>} : memref<32x256xf32, #tpu.memory_space<vmem>>, vector<32x256xf32>,
    return
  }
}

</mosaic_0001>

<bundles_post_ra>
// kernel: tpu_custom_call.1
= control target key start
LH: loop header
LB: loop body
LE: loop exit
PB: predicated region body
PF: predicated region fallthrough
CT: control target
= control target key end

     0   :  { %9 = vsyncpa [#allocation3], 0  ;;  %s1507_s0 = inlined_call_operand.vmem [shape: f32[32,256], index: 0, kind: input, shape index: {}]   ;;  %s1508_s1 = inlined_call_operand.hbm [shape: f32[8,256], index: 1, kind: input, shape index: {}]   ;;  %s1509_s2 = inlined_call_operand.hbm [shape: bf16[2,32,32], index: 2, kind: input, shape index: {}]   ;;  %s1510_s3 = inlined_call_operand.vmem [shape: f32[2,32,1], index: 3, kind: input, shape index: {}]   ;;  %s1511_s4 = inlined_call_operand.hbm [shape: f32[32,256], index: 4, kind: output, shape index: {}]  }
   0x1   :  { %10 = vsyncpa [#allocation6], 0 }
   0x2   :  { %11 = vsyncpa [#allocation4], 0  ;;  %s865_s15 = smov [#allocation2]   ;;  %s866_s17 = smov [#allocation5]  }
   0x3   :  { %s20_s16 = sshll.u32 %s865_s15, 4  ;;  %s29_s18 = sshll.u32 %s866_s17, 4  ;;  %s21_s16 = int_to_ptr.vmem [resolvable:$true] %s20_s16  ;;  %s30_s18 = int_to_ptr.vmem [resolvable:$true] %s29_s18 }
   0x4   :  { %s807_s19 = scalar_lea.vmem %s21_s16, 256  ;;  %p812_p1 = scmp.lt.s32.totalorder %s21_s16, %s21_s16 }
   0x5   :  { %p808_p0 = scmp.ne.s32.totalorder %s21_s16, %s807_s19  ;;  %p813_p2 = scmp.lt.s32.totalorder %s807_s19, %s807_s19 }
   0x7   :  { %p814_p3 = por %p813_p2, %p812_p1 }
   0x9   :  { %p815_p4 = pnand %p814_p3, %p808_p0 }
   0xb   :  { %818 = shalt.err (!%p815_p4)
}
   0xc   :  { %23 = dma.hbm_to_vmem [thread:$0]  %s1508_s1, 256, %s21_s16, [#allocation3]  }
   0xd   :  { %s827_s22 = scalar_lea.vmem %s30_s18, 512  ;;  %p832_p6 = scmp.lt.s32.totalorder %s30_s18, %s30_s18 }
   0xe   :  { %p828_p5 = scmp.ne.s32.totalorder %s30_s18, %s827_s22  ;;  %p833_p7 = scmp.lt.s32.totalorder %s827_s22, %s827_s22 }
  0x10   :  { %p834_p8 = por %p833_p7, %p832_p6 }
  0x12   :  { %p835_p9 = pnand %p834_p8, %p828_p5 }
  0x14   :  { %838 = shalt.err (!%p835_p9)
}
  0x15   :  { %s867_s23 = smov 64   ;;  %s868_s24 = smov 4  }
  0x16   :  { %35 = dma.hbm_to_vmem [thread:$0]  %s1509_s2, 512, %s30_s18, [#allocation6], %s867_s23, %s867_s23, %s868_s24  }
  0x17   :  { %859 = dma.done.wait [#allocation3], 256  }
  0x18   :  { %860 = vsyncadd [#allocation3], 4294967040 }
  0x19   :  { %861 = dma.done.wait [#allocation6], 512  }
  0x1a   :  { %862 = vsyncadd [#allocation6], 4294966784  ;;  %v869_v0 = vmov 0   ;;  %v914_v1 = vld [vmem:[%s1507_s0 + $0x28] sm:$0xff]  ;;  %v919_v2 = vld [vmem:[%s1507_s0 + $0x38] sm:$0xff]  ;;  %vm80_vm0 = vcmask 261120   ;;  %v141_v17 = vlaneseq }
  0x1b   :  { %119 = vmatprep.mubr.bf16.mxu0 %v869_v0  ;;  %794 = vset.pattern.permute.xlu1 %v869_v0  ;;  %v924_v3 = vld [vmem:[%s1507_s0 + $0x20] sm:$0xff]  ;;  %v69_v4 = vpack.c.bf16 %v919_v2, %v914_v1  ;;  %v931_v5 = vld [vmem:[%s1507_s0 + $0x30] sm:$0xff]  ;;  %v936_v6 = vld [vmem:[%s1507_s0 + $0x8] sm:$0xff]  ;;  %s871_s19 = smov 127   ;;  %s872_s20 = smov 16  }
  0x1c   :  { %793 = vset.pattern.permute.xlu0 %v869_v0  ;;  %490 = vmatprep.mubr.bf16.mxu1 %v869_v0  ;;  %v941_v7 = vld [vmem:[%s1507_s0 + $0x18] sm:$0xff]  ;;  %v68_v8 = vpack.c.bf16 %v931_v5, %v924_v3  ;;  %v950_v10 = vld [vmem:[%s1507_s0] sm:$0xff]  ;;  %v955_v11 = vld [vmem:[%s1507_s0 + $0x10] sm:$0xff]  ;;  %v142_v18 = vshrl.u32 %v141_v17, 7  ;;  %s870_s0 = smov 112   ;;  %s873_s21 = smov 1  }
  0x1d   :  { %v67_v9 = vpack.c.bf16 %v941_v7, %v936_v6  ;;  %99 = vmatprep.subr.bf16.mxu0 %v69_v4  ;;  %v66_v12 = vpack.c.bf16 %v955_v11, %v950_v10  ;;  %v380_v13 = vld [vmem:[%s1510_s3 + $0x18] sm:$0xff]  ;;  %v379_v14 = vld [vmem:[%s1510_s3 + $0x10] sm:$0xff]  ;;  %v53_v20 = vld [vmem:[#allocation2] ss:$8 sm:$0x3]  ;;  %v1084_v48 = vand.u32 127, %v141_v17 }
  0x1e   :  { %100 = vmatpush1.bf16.msra.mxu0 %v68_v8  ;;  %398 = vperm.xlu1 %794, %v380_v13   ;;  %v795_v15 = vld [vmem:[#allocation5] sm:$0xff]   ;;  %v796_v16 = vld [vmem:[#allocation5 + $0x8] sm:$0xff]   ;;  %v969_v19 = vsub.s32 0, %v142_v18  ;;  %v977_v24 = vsub.s32 1, %v142_v18  ;;  %v378_v40 = vld [vmem:[%s1510_s3 + $0x8] sm:$0xff] }
  0x1f   :  { %101 = vmatprep.subr.bf16.mxu0 %v67_v9  ;;  %393 = vperm.xlu0 %793, %v379_v14   ;;  %v377_v41 = vld [vmem:[%s1510_s3] sm:$0xff]  ;;  %v779_v42 = vld [vmem:[%s1510_s3 + $0x28] sm:$0xff]  ;;  %vm185_vm1 = vcmp.lt.s32.totalorder %v1084_v48, 127  ;;  %vm289_vm2 = vcmp.lt.s32.totalorder %v1084_v48, 112  ;;  %vm237_vm3 = vcmp.lt.s32.totalorder %v1084_v48, 1  ;;  %vm341_vm4 = vcmp.lt.s32.totalorder %v1084_v48, 16 }
  0x20   :  { %v972_v21 = vrot.slane %v53_v20, %v969_v19  ;;  %v984_v25 = vrot.slane %v53_v20, %v977_v24  ;;  %v778_v43 = vld [vmem:[%s1510_s3 + $0x20] sm:$0xff] }
  0x21   :  { %v55_v49 = vld [vmem:[#allocation2 + $0x1] ss:$8 sm:$0x3]  ;;  %v57_v54 = vld [vmem:[#allocation2 + $0x2] ss:$8 sm:$0x3] }
  0x22   :  { %102 = vmatpush1.bf16.msra.mxu0 %v66_v12  ;;  %v1088_v52 = vrot.slane %v55_v49, %v969_v19  ;;  %v1091_v53 = vrot.slane %v55_v49, %v977_v24  ;;  %v59_v57 = vld [vmem:[#allocation2 + $0x3] ss:$8 sm:$0x3]  ;;  %v1102_v62 = vrot.slane %v57_v54, %v969_v19  ;;  %v1105_v63 = vrot.slane %v57_v54, %v977_v24 }
  0x23   :  { %v1108_v4 = vrot.slane %v59_v57, %v969_v19  ;;  %v1111_v8 = vrot.slane %v59_v57, %v977_v24 }
  0x25   :  { %772 = vmatmul.mubr.msk.bf16.vlgmr.msra.gmra.mxu0 %vm80_vm0, %v795_v15 }
  0x26   :  { %129 = vmatprep.mubr.bf16.mxu0 %v869_v0 }
  0x2d   :  { %773 = vmatmul.mubr.msk.bf16.gmra.mxu0 %vm80_vm0, %v796_v16 }
  0x99   :  { %v1079_v44 = vpop.permute.xlu1 %398 }
  0x9a   :  { %v1081_v45 = vpop.permute.xlu0 %393 }
  0xe5   :  { %v121_v22 = vpop.f32.mrf.mxu0 }
  0xe6   :  { %v975_v23 = vmul.f32 %v972_v21, %v121_v22 }
  0xe7   :  { %v123_v26 = vpop.f32.mrf.mxu0 }
  0xe8   :  { %273 = vrot.lane.b32.xlu1 %v975_v23, %s870_s0  ;;  %167 = vrot.lane.b32.xlu0 %v975_v23, %s871_s19  ;;  %v991_v27 = vmul.f32 %v984_v25, %v123_v26  ;;  %v159_v9 = vmul.f32 %v975_v23, %v972_v21 }
  0xe9   :  { %v125_v28 = vpop.f32.mrf.mxu0 }
  0xea   :  { %v998_v29 = vmul.f32 %v972_v21, %v125_v28  ;;  %v160_v12 = vmul.f32 %v991_v27, %v984_v25 }
  0xeb   :  { %v127_v30 = vpop.f32.mrf.mxu0 }
  0xec   :  { %325 = vrot.lane.b32.xlu1 %v975_v23, %s872_s20  ;;  %221 = vrot.lane.b32.xlu0 %v975_v23, %s873_s21  ;;  %v1009_v31 = vmul.f32 %v984_v25, %v127_v30 }
  0xed   :  { %v131_v32 = vpop.f32.mrf.mxu0 }
  0xee   :  { %v1012_v33 = vmul.f32 %v972_v21, %v131_v32 }
  0xef   :  { %v133_v34 = vpop.f32.mrf.mxu0 }
  0xf0   :  { %281 = vrot.lane.b32.xlu1 %v991_v27, %s870_s0  ;;  %175 = vrot.lane.b32.xlu0 %v991_v27, %s871_s19  ;;  %v1023_v35 = vmul.f32 %v984_v25, %v133_v34 }
  0xf1   :  { %v135_v36 = vpop.f32.mrf.mxu0 }
  0xf2   :  { %v1034_v37 = vmul.f32 %v972_v21, %v135_v36 }
  0xf3   :  { %v137_v38 = vpop.f32.mrf.mxu0 }
  0xf4   :  { %229 = vrot.lane.b32.xlu0 %v991_v27, %s873_s21  ;;  %169 = vrot.lane.b32.xlu1 %v998_v29, %s871_s19  ;;  %v1049_v39 = vmul.f32 %v984_v25, %v137_v38 }
  0xf8   :  { %275 = vrot.lane.b32.xlu0 %v998_v29, %s870_s0  ;;  %223 = vrot.lane.b32.xlu1 %v998_v29, %s873_s21 }
  0xfc   :  { %283 = vrot.lane.b32.xlu0 %v1009_v31, %s870_s0  ;;  %177 = vrot.lane.b32.xlu1 %v1009_v31, %s871_s19 }
 0x100   :  { %231 = vrot.lane.b32.xlu1 %v1009_v31, %s873_s21  ;;  %171 = vrot.lane.b32.xlu0 %v1012_v33, %s871_s19 }
 0x104   :  { %225 = vrot.lane.b32.xlu0 %v1012_v33, %s873_s21  ;;  %179 = vrot.lane.b32.xlu1 %v1023_v35, %s871_s19 }
 0x108   :  { %277 = vrot.lane.b32.xlu0 %v1012_v33, %s870_s0  ;;  %333 = vrot.lane.b32.xlu1 %v991_v27, %s872_s20 }
 0x10c   :  { %329 = vrot.lane.b32.xlu0 %v1012_v33, %s872_s20  ;;  %227 = vrot.lane.b32.xlu1 %v1034_v37, %s873_s21 }
 0x110   :  { %233 = vrot.lane.b32.xlu0 %v1023_v35, %s873_s21  ;;  %279 = vrot.lane.b32.xlu1 %v1034_v37, %s870_s0 }
 0x114   :  { %285 = vrot.lane.b32.xlu0 %v1023_v35, %s870_s0  ;;  %331 = vrot.lane.b32.xlu1 %v1034_v37, %s872_s20 }
 0x118   :  { %337 = vrot.lane.b32.xlu0 %v1023_v35, %s872_s20  ;;  %181 = vrot.lane.b32.xlu1 %v1049_v39, %s871_s19 }
 0x11c   :  { %173 = vrot.lane.b32.xlu0 %v1034_v37, %s871_s19  ;;  %235 = vrot.lane.b32.xlu1 %v1049_v39, %s873_s21 }
 0x120   :  { %327 = vrot.lane.b32.xlu0 %v998_v29, %s872_s20  ;;  %287 = vrot.lane.b32.xlu1 %v1049_v39, %s870_s0 }
 0x124   :  { %335 = vrot.lane.b32.xlu0 %v1009_v31, %s872_s20  ;;  %339 = vrot.lane.b32.xlu1 %v1049_v39, %s872_s20 }
 0x128   :  { %388 = vperm.xlu0 %793, %v378_v40   ;;  %383 = vperm.xlu1 %794, %v377_v41  }
 0x12c   :  { %699 = vperm.xlu0 %793, %v779_v42   ;;  %694 = vperm.xlu1 %794, %v778_v43  }
 0x15a   :  { %v274_v46 = vpop.permute.xlu1 %273  ;;  %v168_v47 = vpop.permute.xlu0 %167 }
 0x15e   :  { %v326_v50 = vpop.permute.xlu1 %325  ;;  %v222_v51 = vpop.permute.xlu0 %221 }
 0x162   :  { %v282_v55 = vpop.permute.xlu1 %281  ;;  %v176_v56 = vpop.permute.xlu0 %175 }
 0x163   :  { %v186_v58 = vsel %vm185_vm1, %v168_v47, %v176_v56  ;;  %v190_v59 = vsel %vm185_vm1, %v176_v56, %v168_v47  ;;  %v290_v15 = vsel %vm289_vm2, %v274_v46, %v282_v55  ;;  %v294_v16 = vsel %vm289_vm2, %v282_v55, %v274_v46  ;;  %v61_v47 = vld [vmem:[#allocation2 + $0x4] ss:$8 sm:$0x3] }
 0x164   :  { %v205_v60 = vmul.f32 %v1088_v52, %v186_v58  ;;  %v206_v61 = vmul.f32 %v1091_v53, %v190_v59  ;;  %v309_v27 = vmul.f32 %v1108_v4, %v290_v15  ;;  %v310_v28 = vmul.f32 %v1111_v8, %v294_v16 }
 0x165   :  { %v1143_v54 = vrot.slane %v61_v47, %v969_v19  ;;  %v1146_v55 = vrot.slane %v61_v47, %v977_v24 }
 0x166   :  { %v230_v13 = vpop.permute.xlu0 %229  ;;  %v1117_v14 = vpop.permute.xlu1 %169  ;;  %v213_v20 = vadd.f32 %v205_v60, %v159_v9  ;;  %v214_v22 = vadd.f32 %v206_v61, %v160_v12 }
 0x167   :  { %v238_v17 = vsel %vm237_vm3, %v222_v51, %v230_v13  ;;  %v242_v18 = vsel %vm237_vm3, %v230_v13, %v222_v51 }
 0x168   :  { %v257_v23 = vmul.f32 %v1102_v62, %v242_v18  ;;  %v258_v26 = vmul.f32 %v1105_v63, %v238_v17 }
 0x16a   :  { %v265_v30 = vadd.f32 %v257_v23, %v213_v20  ;;  %v266_v32 = vadd.f32 %v258_v26, %v214_v22  ;;  %v1131_v34 = vpop.permute.xlu0 %275  ;;  %v1133_v36 = vpop.permute.xlu1 %223  ;;  %v163_v23 = vmul.f32 %v1012_v33, %v972_v21  ;;  %v164_v26 = vmul.f32 %v1023_v35, %v984_v25 }
 0x16c   :  { %v317_v38 = vadd.f32 %v309_v27, %v265_v30  ;;  %v318_v40 = vadd.f32 %v310_v28, %v266_v32 }
 0x16e   :  { %v1135_v41 = vpop.permute.xlu0 %283  ;;  %v1137_v42 = vpop.permute.xlu1 %177 }
 0x172   :  { %v1139_v43 = vpop.permute.xlu1 %231  ;;  %v172_v46 = vpop.permute.xlu0 %171 }
 0x176   :  { %v226_v49 = vpop.permute.xlu0 %225  ;;  %v180_v51 = vpop.permute.xlu1 %179 }
 0x177   :  { %v188_v24 = vsel %vm185_vm1, %v172_v46, %v180_v51  ;;  %v192_v15 = vsel %vm185_vm1, %v180_v51, %v172_v46 }
 0x178   :  { %v209_v20 = vmul.f32 %v1088_v52, %v188_v24  ;;  %v210_v22 = vmul.f32 %v1091_v53, %v192_v15 }
 0x17a   :  { %v278_v56 = vpop.permute.xlu0 %277  ;;  %v334_v57 = vpop.permute.xlu1 %333  ;;  %v217_v46 = vadd.f32 %v209_v20, %v163_v23  ;;  %v218_v47 = vadd.f32 %v210_v22, %v164_v26 }
 0x17b   :  { %v342_v58 = vsel %vm341_vm4, %v326_v50, %v334_v57  ;;  %v346_v59 = vsel %vm341_vm4, %v334_v57, %v326_v50 }
 0x17c   :  { %v361_v60 = vmul.f32 %v1143_v54, %v346_v59  ;;  %v362_v61 = vmul.f32 %v1146_v55, %v342_v58 }
 0x17e   :  { %v330_v9 = vpop.permute.xlu0 %329  ;;  %v228_v12 = vpop.permute.xlu1 %227  ;;  %v1154_v13 = vadd.f32 %v361_v60, %v317_v38  ;;  %v1156_v19 = vadd.f32 %v362_v61, %v318_v40 }
 0x182   :  { %v234_v16 = vpop.permute.xlu0 %233  ;;  %v280_v17 = vpop.permute.xlu1 %279 }
 0x183   :  { %v240_v50 = vsel %vm237_vm3, %v226_v49, %v234_v16  ;;  %v244_v18 = vsel %vm237_vm3, %v234_v16, %v226_v49 }
 0x184   :  { %v261_v27 = vmul.f32 %v1102_v62, %v244_v18  ;;  %v262_v28 = vmul.f32 %v1105_v63, %v240_v50 }
 0x186   :  { %v286_v30 = vpop.permute.xlu0 %285  ;;  %v332_v32 = vpop.permute.xlu1 %331  ;;  %v269_v51 = vadd.f32 %v261_v27, %v217_v46  ;;  %v270_v35 = vadd.f32 %v262_v28, %v218_v47  ;;  %v165_v27 = vmul.f32 %v1034_v37, %v972_v21  ;;  %v166_v28 = vmul.f32 %v1049_v39, %v984_v25 }
 0x187   :  { %v292_v38 = vsel %vm289_vm2, %v278_v56, %v286_v30  ;;  %v296_v40 = vsel %vm289_vm2, %v286_v30, %v278_v56 }
 0x188   :  { %v313_v49 = vmul.f32 %v1108_v4, %v292_v38  ;;  %v314_v33 = vmul.f32 %v1111_v8, %v296_v40  ;;  %v187_v40 = vsel %vm185_vm1, %v1117_v14, %v1137_v42 }
 0x18a   :  { %v338_v57 = vpop.permute.xlu0 %337  ;;  %v182_v58 = vpop.permute.xlu1 %181  ;;  %v321_v61 = vadd.f32 %v313_v49, %v269_v51  ;;  %v322_v24 = vadd.f32 %v314_v33, %v270_v35 }
 0x18b   :  { %v344_v59 = vsel %vm341_vm4, %v330_v9, %v338_v57  ;;  %v348_v60 = vsel %vm341_vm4, %v338_v57, %v330_v9  ;;  %v239_v57 = vsel %vm237_vm3, %v1133_v36, %v1139_v43 }
 0x18c   :  { %v365_v56 = vmul.f32 %v1143_v54, %v348_v60  ;;  %v366_v15 = vmul.f32 %v1146_v55, %v344_v59 }
 0x18e   :  { %v373_v16 = vadd.f32 %v365_v56, %v321_v61  ;;  %v374_v50 = vadd.f32 %v366_v15, %v322_v24  ;;  %v174_v18 = vpop.permute.xlu0 %173  ;;  %v236_v20 = vpop.permute.xlu1 %235  ;;  %v161_v24 = vmul.f32 %v998_v29, %v972_v21  ;;  %v162_v56 = vmul.f32 %v1009_v31, %v984_v25 }
 0x18f   :  { %v189_v22 = vsel %vm185_vm1, %v174_v18, %v182_v58  ;;  %v193_v23 = vsel %vm185_vm1, %v182_v58, %v174_v18  ;;  %v241_v26 = vsel %vm237_vm3, %v228_v12, %v236_v20  ;;  %v245_v9 = vsel %vm237_vm3, %v236_v20, %v228_v12 }
 0x190   :  { %v211_v30 = vmul.f32 %v1088_v52, %v189_v22  ;;  %v212_v38 = vmul.f32 %v1091_v53, %v193_v23  ;;  %v191_v12 = vsel %vm185_vm1, %v1137_v42, %v1117_v14  ;;  %v406_v46 = vadd.f32 %v1081_v45, %v374_v50 }
 0x191   :  { %v405_v37 = vadd.f32 %v1081_v45, %v373_v16  ;;  %v263_v49 = vmul.f32 %v1102_v62, %v245_v9  ;;  %v264_v33 = vmul.f32 %v1105_v63, %v241_v26  ;;  %v243_v14 = vsel %vm237_vm3, %v1139_v43, %v1133_v36 }
 0x192   :  { %v219_v47 = vadd.f32 %v211_v30, %v165_v27  ;;  %v220_v39 = vadd.f32 %v212_v38, %v166_v28  ;;  %v328_v51 = vpop.permute.xlu0 %327  ;;  %v288_v35 = vpop.permute.xlu1 %287  ;;  %v207_v36 = vmul.f32 %v1088_v52, %v187_v40  ;;  %v208_v43 = vmul.f32 %v1091_v53, %v191_v12 }
 0x193   :  { %v293_v45 = vsel %vm289_vm2, %v280_v17, %v288_v35  ;;  %v297_v42 = vsel %vm289_vm2, %v288_v35, %v280_v17  ;;  %v259_v16 = vmul.f32 %v1102_v62, %v243_v14  ;;  %v260_v17 = vmul.f32 %v1105_v63, %v239_v57 }
 0x194   :  { %v271_v58 = vadd.f32 %v263_v49, %v219_v47  ;;  %v272_v59 = vadd.f32 %v264_v33, %v220_v39  ;;  %v315_v60 = vmul.f32 %v1108_v4, %v293_v45  ;;  %v316_v61 = vmul.f32 %v1111_v8, %v297_v42 }
 0x195   :  { %v291_v26 = vsel %vm289_vm2, %v1131_v34, %v1135_v41  ;;  %v295_v9 = vsel %vm289_vm2, %v1135_v41, %v1131_v34  ;;  %v215_v27 = vadd.f32 %v207_v36, %v161_v24  ;;  %v216_v28 = vadd.f32 %v208_v43, %v162_v56 }
 0x196   :  { %v340_v15 = vpop.permute.xlu1 %339  ;;  %v323_v20 = vadd.f32 %v315_v60, %v271_v58  ;;  %v324_v29 = vadd.f32 %v316_v61, %v272_v59  ;;  %v336_v22 = vpop.permute.xlu0 %335  ;;  %v414_v12 = vmax.f32 %v406_v46, 0.0  ;;  %v413_v47 = vmax.f32 %v405_v37, 0.0 }
 0x197   :  { %v345_v50 = vsel %vm341_vm4, %v332_v32, %v340_v15  ;;  %v349_v18 = vsel %vm341_vm4, %v340_v15, %v332_v32  ;;  %v343_v38 = vsel %vm341_vm4, %v328_v51, %v336_v22  ;;  %v347_v40 = vsel %vm341_vm4, %v336_v22, %v328_v51 }
 0x198   :  { %v367_v31 = vmul.f32 %v1143_v54, %v349_v18  ;;  %v368_v23 = vmul.f32 %v1146_v55, %v345_v50  ;;  %v267_v39 = vadd.f32 %v259_v16, %v215_v27  ;;  %v268_v49 = vadd.f32 %v260_v17, %v216_v28 }
 0x199   :  { %v311_v34 = vmul.f32 %v1108_v4, %v291_v26  ;;  %v312_v41 = vmul.f32 %v1111_v8, %v295_v9  ;;  %v363_v57 = vmul.f32 %v1143_v54, %v347_v40  ;;  %v364_v14 = vmul.f32 %v1146_v55, %v343_v38  ;;  %v797_v38 = vld [vmem:[#allocation5 + $0x10] sm:$0xff]  }
 0x19a   :  { %v375_v32 = vadd.f32 %v367_v31, %v323_v20  ;;  %v376_v30 = vadd.f32 %v368_v23, %v324_v29  ;;  %v422_v58 = vmul.f32 0.1, %v414_v12  ;;  %v421_v51 = vmul.f32 0.1, %v413_v47 }
 0x19b   :  { %v319_v46 = vadd.f32 %v311_v34, %v267_v39  ;;  %v320_v37 = vadd.f32 %v312_v41, %v268_v49 }
 0x19c   :  { %v408_v33 = vadd.f32 %v1079_v44, %v376_v30  ;;  %v407_v35 = vadd.f32 %v1079_v44, %v375_v32  ;;  %v1265_v15 = vadd.f32 %v422_v58, %v914_v1  ;;  %v1268_v16 = vadd.f32 %v421_v51, %v924_v3  ;;  %v781_v58 = vld [vmem:[%s1510_s3 + $0x38] sm:$0xff] }
 0x19d   :  { %v371_v61 = vadd.f32 %v363_v57, %v319_v46  ;;  %v372_v24 = vadd.f32 %v364_v14, %v320_v37 }
 0x19e   :  { %v416_v45 = vmax.f32 %v408_v33, 0.0  ;;  %v415_v42 = vmax.f32 %v407_v35, 0.0 }
 0x1a0   :  { %v424_v59 = vmul.f32 0.1, %v416_v45  ;;  %v423_v60 = vmul.f32 0.1, %v415_v42  ;;  %v780_v42 = vld [vmem:[%s1510_s3 + $0x30] sm:$0xff]  ;;  %s874_s3 = smov [#allocation7]  }
 0x1a1   :  { %s757_s6 = sshll.u32 %s874_s3, 4  ;;  %s758_s6 = int_to_ptr.vmem [resolvable:$true] %s757_s6 }
 0x1a2   :  { %v1259_v44 = vadd.f32 %v424_v59, %v919_v2  ;;  %v1262_v56 = vadd.f32 %v423_v60, %v931_v5  ;;  %s839_s7 = scalar_lea.vmem %s758_s6, 1024  ;;  %p844_p11 = scmp.lt.s32.totalorder %s758_s6, %s758_s6 }
 0x1a3   :  { %v389_v36 = vpop.permute.xlu0 %388  ;;  %v384_v43 = vpop.permute.xlu1 %383  ;;  %p840_p10 = scmp.ne.s32.totalorder %s758_s6, %s839_s7  ;;  %p845_p12 = scmp.lt.s32.totalorder %s839_s7, %s839_s7 }
 0x1a4   :  { %v403_v17 = vadd.f32 %v389_v36, %v371_v61  ;;  %v404_v50 = vadd.f32 %v389_v36, %v372_v24  ;;  %v401_v18 = vadd.f32 %v384_v43, %v1154_v13  ;;  %v402_v20 = vadd.f32 %v384_v43, %v1156_v19 }
 0x1a5   :  { %v441_v2 = vpack.c.bf16 %v1259_v44, %v1265_v15  ;;  %v440_v5 = vpack.c.bf16 %v1262_v56, %v1268_v16  ;;  %p846_p13 = por %p845_p12, %p844_p11 }
 0x1a6   :  { %v411_v29 = vmax.f32 %v403_v17, 0.0  ;;  %v412_v22 = vmax.f32 %v404_v50, 0.0  ;;  %v409_v31 = vmax.f32 %v401_v18, 0.0  ;;  %v410_v1 = vmax.f32 %v402_v20, 0.0 }
 0x1a7   :  { %470 = vmatprep.subr.bf16.mxu1 %v441_v2  ;;  %v1377_v51 = vpop.permute.xlu1 %694  ;;  %v1379_v46 = vpop.permute.xlu0 %699  ;;  %p847_p0 = pnand %p846_p13, %p840_p10 }
 0x1a8   :  { %v419_v23 = vmul.f32 0.1, %v411_v29  ;;  %v420_v3 = vmul.f32 0.1, %v412_v22  ;;  %v417_v26 = vmul.f32 0.1, %v409_v31  ;;  %471 = vmatpush1.bf16.msra.mxu1 %v440_v5 }
 0x1a9   :  { %v418_v9 = vmul.f32 0.1, %v410_v1 }
 0x1aa   :  { %v1277_v13 = vadd.f32 %v419_v23, %v955_v11  ;;  %v1280_v19 = vadd.f32 %v420_v3, %v941_v7  ;;  %v1283_v27 = vadd.f32 %v417_v26, %v950_v10  ;;  %v798_v7 = vld [vmem:[#allocation5 + $0x18] sm:$0xff]  }
 0x1ab   :  { %v1286_v28 = vadd.f32 %v418_v9, %v936_v6 }
 0x1ac   :  { %v438_v32 = vpack.c.bf16 %v1277_v13, %v1283_v27 }
 0x1ad   :  { %v439_v30 = vpack.c.bf16 %v1280_v19, %v1286_v28 }
 0x1af   :  { %472 = vmatprep.subr.bf16.mxu1 %v439_v30 }
 0x1b0   :  { %473 = vmatpush1.bf16.msra.mxu1 %v438_v32 }
 0x1b3   :  { %776 = vmatmul.mubr.msk.bf16.vlgmr.msra.gmra.mxu1 %vm80_vm0, %v797_v38 }
 0x1b4   :  { %500 = vmatprep.mubr.bf16.mxu1 %v869_v0 }
 0x1bb   :  { %777 = vmatmul.mubr.msk.bf16.gmra.mxu1 %vm80_vm0, %v798_v7 }
 0x273   :  { %v492_v10 = vpop.f32.mrf.mxu1 }
 0x274   :  { %v1296_v6 = vmul.f32 %v492_v10, %v972_v21 }
 0x275   :  { %v494_v11 = vpop.f32.mrf.mxu1 }
 0x276   :  { %527 = vrot.lane.b32.xlu1 %v1296_v6, %s871_s19  ;;  %v512_v0 = vmul.f32 %v494_v11, %v984_v25  ;;  %v519_v26 = vmul.f32 %v1296_v6, %v972_v21 }
 0x277   :  { %v496_v40 = vpop.f32.mrf.mxu1 }
 0x278   :  { %v1301_v12 = vmul.f32 %v496_v40, %v972_v21  ;;  %v520_v9 = vmul.f32 %v512_v0, %v984_v25 }
 0x279   :  { %v498_v47 = vpop.f32.mrf.mxu1 }
 0x27a   :  { %567 = vrot.lane.b32.xlu1 %v1296_v6, %s873_s21  ;;  %529 = vrot.lane.b32.xlu0 %v1301_v12, %s871_s19  ;;  %v514_v39 = vmul.f32 %v498_v47, %v984_v25  ;;  %v521_v38 = vmul.f32 %v1301_v12, %v972_v21 }
 0x27b   :  { %v502_v49 = vpop.f32.mrf.mxu1 }
 0x27c   :  { %v1325_v33 = vmul.f32 %v502_v49, %v972_v21  ;;  %v522_v7 = vmul.f32 %v514_v39, %v984_v25 }
 0x27d   :  { %v504_v35 = vpop.f32.mrf.mxu1 }
 0x27e   :  { %607 = vrot.lane.b32.xlu1 %v1296_v6, %s870_s0  ;;  %569 = vrot.lane.b32.xlu0 %v1301_v12, %s873_s21  ;;  %v1348_v57 = vmul.f32 %v504_v35, %v984_v25 }
 0x27f   :  { %v506_v34 = vpop.f32.mrf.mxu1 }
 0x280   :  { %v1333_v41 = vmul.f32 %v506_v34, %v972_v21 }
 0x281   :  { %v508_v14 = vpop.f32.mrf.mxu1 }
 0x282   :  { %647 = vrot.lane.b32.xlu1 %v1296_v6, %s872_s20  ;;  %609 = vrot.lane.b32.xlu0 %v1301_v12, %s870_s0  ;;  %v1355_v45 = vmul.f32 %v508_v14, %v984_v25 }
 0x286   :  { %535 = vrot.lane.b32.xlu1 %v512_v0, %s871_s19  ;;  %649 = vrot.lane.b32.xlu0 %v1301_v12, %s872_s20 }
 0x28a   :  { %575 = vrot.lane.b32.xlu1 %v512_v0, %s873_s21  ;;  %537 = vrot.lane.b32.xlu0 %v514_v39, %s871_s19 }
 0x28e   :  { %615 = vrot.lane.b32.xlu1 %v512_v0, %s870_s0  ;;  %577 = vrot.lane.b32.xlu0 %v514_v39, %s873_s21 }
 0x292   :  { %655 = vrot.lane.b32.xlu1 %v512_v0, %s872_s20  ;;  %617 = vrot.lane.b32.xlu0 %v514_v39, %s870_s0 }
 0x296   :  { %657 = vrot.lane.b32.xlu0 %v514_v39, %s872_s20  ;;  %531 = vrot.lane.b32.xlu1 %v1325_v33, %s871_s19 }
 0x29a   :  { %571 = vrot.lane.b32.xlu1 %v1325_v33, %s873_s21  ;;  %533 = vrot.lane.b32.xlu0 %v1333_v41, %s871_s19 }
 0x29e   :  { %611 = vrot.lane.b32.xlu1 %v1325_v33, %s870_s0  ;;  %573 = vrot.lane.b32.xlu0 %v1333_v41, %s873_s21 }
 0x2a2   :  { %651 = vrot.lane.b32.xlu1 %v1325_v33, %s872_s20  ;;  %613 = vrot.lane.b32.xlu0 %v1333_v41, %s870_s0 }
 0x2a6   :  { %539 = vrot.lane.b32.xlu1 %v1348_v57, %s871_s19  ;;  %653 = vrot.lane.b32.xlu0 %v1333_v41, %s872_s20 }
 0x2aa   :  { %579 = vrot.lane.b32.xlu1 %v1348_v57, %s873_s21  ;;  %541 = vrot.lane.b32.xlu0 %v1355_v45, %s871_s19 }
 0x2ae   :  { %619 = vrot.lane.b32.xlu1 %v1348_v57, %s870_s0  ;;  %581 = vrot.lane.b32.xlu0 %v1355_v45, %s873_s21 }
 0x2b2   :  { %659 = vrot.lane.b32.xlu1 %v1348_v57, %s872_s20  ;;  %621 = vrot.lane.b32.xlu0 %v1355_v45, %s870_s0 }
 0x2b6   :  { %704 = vperm.xlu1 %794, %v780_v42   ;;  %661 = vrot.lane.b32.xlu0 %v1355_v45, %s872_s20 }
 0x2ba   :  { %709 = vperm.xlu0 %793, %v781_v58  }
 0x2e8   :  { %v528_v37 = vpop.permute.xlu1 %527 }
 0x2ec   :  { %v568_v59 = vpop.permute.xlu1 %567  ;;  %v530_v60 = vpop.permute.xlu0 %529 }
 0x2f0   :  { %v608_v61 = vpop.permute.xlu1 %607  ;;  %v570_v24 = vpop.permute.xlu0 %569 }
 0x2f4   :  { %v648_v36 = vpop.permute.xlu1 %647  ;;  %v610_v43 = vpop.permute.xlu0 %609 }
 0x2f8   :  { %v536_v17 = vpop.permute.xlu1 %535  ;;  %v650_v50 = vpop.permute.xlu0 %649 }
 0x2f9   :  { %v543_v18 = vsel %vm185_vm1, %v528_v37, %v536_v17  ;;  %v547_v20 = vsel %vm185_vm1, %v536_v17, %v528_v37 }
 0x2fa   :  { %v551_v2 = vmul.f32 %v543_v18, %v1088_v52  ;;  %v552_v5 = vmul.f32 %v547_v20, %v1091_v53 }
 0x2fc   :  { %v576_v29 = vpop.permute.xlu1 %575  ;;  %v538_v22 = vpop.permute.xlu0 %537  ;;  %v559_v10 = vadd.f32 %v551_v2, %v519_v26  ;;  %v560_v11 = vadd.f32 %v552_v5, %v520_v9 }
 0x2fd   :  { %v583_v31 = vsel %vm237_vm3, %v568_v59, %v576_v29  ;;  %v587_v1 = vsel %vm237_vm3, %v576_v29, %v568_v59  ;;  %v544_v23 = vsel %vm185_vm1, %v530_v60, %v538_v22  ;;  %v548_v3 = vsel %vm185_vm1, %v538_v22, %v530_v60 }
 0x2fe   :  { %v591_v32 = vmul.f32 %v587_v1, %v1102_v62  ;;  %v592_v30 = vmul.f32 %v583_v31, %v1105_v63  ;;  %v553_v40 = vmul.f32 %v544_v23, %v1088_v52  ;;  %v554_v47 = vmul.f32 %v548_v3, %v1091_v53 }
 0x300   :  { %v616_v49 = vpop.permute.xlu1 %615  ;;  %v578_v35 = vpop.permute.xlu0 %577  ;;  %v599_v39 = vadd.f32 %v591_v32, %v559_v10  ;;  %v600_v14 = vadd.f32 %v592_v30, %v560_v11  ;;  %v561_v60 = vadd.f32 %v553_v40, %v521_v38  ;;  %v562_v17 = vadd.f32 %v554_v47, %v522_v7 }
 0x301   :  { %v623_v6 = vsel %vm289_vm2, %v608_v61, %v616_v49  ;;  %v627_v0 = vsel %vm289_vm2, %v616_v49, %v608_v61  ;;  %v584_v34 = vsel %vm237_vm3, %v570_v24, %v578_v35  ;;  %v588_v12 = vsel %vm237_vm3, %v578_v35, %v570_v24 }
 0x302   :  { %v631_v42 = vmul.f32 %v623_v6, %v1108_v4  ;;  %v632_v58 = vmul.f32 %v627_v0, %v1111_v8  ;;  %v593_v37 = vmul.f32 %v588_v12, %v1102_v62  ;;  %v594_v59 = vmul.f32 %v584_v34, %v1105_v63 }
 0x304   :  { %v639_v18 = vadd.f32 %v631_v42, %v599_v39  ;;  %v640_v61 = vadd.f32 %v632_v58, %v600_v14  ;;  %v656_v20 = vpop.permute.xlu1 %655  ;;  %v618_v2 = vpop.permute.xlu0 %617  ;;  %v601_v26 = vadd.f32 %v593_v37, %v561_v60  ;;  %v602_v9 = vadd.f32 %v594_v59, %v562_v17 }
 0x305   :  { %v663_v5 = vsel %vm341_vm4, %v648_v36, %v656_v20  ;;  %v667_v24 = vsel %vm341_vm4, %v656_v20, %v648_v36  ;;  %v624_v29 = vsel %vm289_vm2, %v610_v43, %v618_v2  ;;  %v628_v22 = vsel %vm289_vm2, %v618_v2, %v610_v43 }
 0x306   :  { %v671_v31 = vmul.f32 %v667_v24, %v1143_v54  ;;  %v672_v1 = vmul.f32 %v663_v5, %v1146_v55  ;;  %v633_v23 = vmul.f32 %v624_v29, %v1108_v4  ;;  %v634_v3 = vmul.f32 %v628_v22, %v1111_v8 }
 0x308   :  { %v679_v32 = vadd.f32 %v671_v31, %v639_v18  ;;  %v680_v30 = vadd.f32 %v672_v1, %v640_v61  ;;  %v658_v38 = vpop.permute.xlu0 %657  ;;  %v532_v36 = vpop.permute.xlu1 %531  ;;  %v641_v7 = vadd.f32 %v633_v23, %v601_v26  ;;  %v642_v10 = vadd.f32 %v634_v3, %v602_v9 }
 0x309   :  { %v664_v11 = vsel %vm341_vm4, %v650_v50, %v658_v38  ;;  %v668_v43 = vsel %vm341_vm4, %v658_v38, %v650_v50 }
 0x30a   :  { %v712_v40 = vadd.f32 %v1377_v51, %v679_v32  ;;  %v713_v47 = vadd.f32 %v1377_v51, %v680_v30  ;;  %v673_v49 = vmul.f32 %v668_v43, %v1143_v54  ;;  %v674_v35 = vmul.f32 %v664_v11, %v1146_v55 }
 0x30b   :  { %v526_v11 = vmul.f32 %v1355_v45, %v984_v25 }
 0x30c   :  { %v720_v6 = vmax.f32 %v712_v40, 0.0  ;;  %v721_v0 = vmax.f32 %v713_v47, 0.0  ;;  %v681_v34 = vadd.f32 %v673_v49, %v641_v7  ;;  %v682_v12 = vadd.f32 %v674_v35, %v642_v10  ;;  %v572_v39 = vpop.permute.xlu1 %571  ;;  %v534_v14 = vpop.permute.xlu0 %533 }
 0x30e   :  { %v728_v42 = vmul.f32 0.1, %v720_v6  ;;  %v729_v58 = vmul.f32 0.1, %v721_v0  ;;  %v714_v37 = vadd.f32 %v1379_v46, %v681_v34  ;;  %v715_v50 = vadd.f32 %v1379_v46, %v682_v12 }
 0x310   :  { %v736_v59 = vadd.f32 %v728_v42, %v1283_v27  ;;  %v737_v51 = vadd.f32 %v729_v58, %v1286_v28  ;;  %v722_v60 = vmax.f32 %v714_v37, 0.0  ;;  %v723_v17 = vmax.f32 %v715_v50, 0.0  ;;  %v612_v18 = vpop.permute.xlu1 %611  ;;  %v574_v61 = vpop.permute.xlu0 %573 }
 0x312   :  { %744 = vst [vmem:[#allocation7] sm:$0xff] %v736_v59  ;;  %745 = vst [vmem:[#allocation7 + $0x8] sm:$0xff] %v737_v51  ;;  %v730_v20 = vmul.f32 0.1, %v722_v60  ;;  %v731_v2 = vmul.f32 0.1, %v723_v17 }
 0x314   :  { %v738_v5 = vadd.f32 %v730_v20, %v1277_v13  ;;  %v739_v24 = vadd.f32 %v731_v2, %v1280_v19  ;;  %v652_v29 = vpop.permute.xlu1 %651  ;;  %v614_v22 = vpop.permute.xlu0 %613  ;;  %v523_v13 = vmul.f32 %v1325_v33, %v972_v21  ;;  %v524_v19 = vmul.f32 %v1348_v57, %v984_v25 }
 0x315   :  { %v525_v57 = vmul.f32 %v1333_v41, %v972_v21 }
 0x316   :  { %746 = vst [vmem:[#allocation7 + $0x10] sm:$0xff] %v738_v5  ;;  %747 = vst [vmem:[#allocation7 + $0x18] sm:$0xff] %v739_v24 }
 0x318   :  { %v540_v46 = vpop.permute.xlu1 %539  ;;  %v654_v27 = vpop.permute.xlu0 %653 }
 0x319   :  { %v545_v3 = vsel %vm185_vm1, %v532_v36, %v540_v46  ;;  %v549_v26 = vsel %vm185_vm1, %v540_v46, %v532_v36 }
 0x31a   :  { %v555_v38 = vmul.f32 %v545_v3, %v1088_v52  ;;  %v556_v7 = vmul.f32 %v549_v26, %v1091_v53 }
 0x31c   :  { %v580_v31 = vpop.permute.xlu1 %579  ;;  %v542_v28 = vpop.permute.xlu0 %541  ;;  %v563_v0 = vadd.f32 %v555_v38, %v523_v13  ;;  %v564_v34 = vadd.f32 %v556_v7, %v524_v19 }
 0x31d   :  { %v585_v32 = vsel %vm237_vm3, %v572_v39, %v580_v31  ;;  %v589_v30 = vsel %vm237_vm3, %v580_v31, %v572_v39  ;;  %v546_v36 = vsel %vm185_vm1, %v534_v14, %v542_v28  ;;  %v550_v10 = vsel %vm185_vm1, %v542_v28, %v534_v14 }
 0x31e   :  { %v595_v47 = vmul.f32 %v589_v30, %v1102_v62  ;;  %v596_v49 = vmul.f32 %v585_v32, %v1105_v63  ;;  %v557_v21 = vmul.f32 %v546_v36, %v1088_v52  ;;  %v558_v25 = vmul.f32 %v550_v10, %v1091_v53 }
 0x320   :  { %v620_v1 = vpop.permute.xlu1 %619  ;;  %v582_v23 = vpop.permute.xlu0 %581  ;;  %v603_v37 = vadd.f32 %v595_v47, %v563_v0  ;;  %v604_v50 = vadd.f32 %v596_v49, %v564_v34  ;;  %v565_v60 = vadd.f32 %v557_v21, %v525_v57  ;;  %v566_v17 = vadd.f32 %v558_v25, %v526_v11 }
 0x321   :  { %v625_v43 = vsel %vm289_vm2, %v612_v18, %v620_v1  ;;  %v629_v40 = vsel %vm289_vm2, %v620_v1, %v612_v18  ;;  %v586_v35 = vsel %vm237_vm3, %v574_v61, %v582_v23  ;;  %v590_v6 = vsel %vm237_vm3, %v582_v23, %v574_v61 }
 0x322   :  { %v635_v12 = vmul.f32 %v625_v43, %v1108_v4  ;;  %v636_v39 = vmul.f32 %v629_v40, %v1111_v8  ;;  %v597_v42 = vmul.f32 %v590_v6, %v1102_v62  ;;  %v598_v58 = vmul.f32 %v586_v35, %v1105_v63 }
 0x324   :  { %v622_v9 = vpop.permute.xlu0 %621  ;;  %v660_v33 = vpop.permute.xlu1 %659  ;;  %v643_v20 = vadd.f32 %v635_v12, %v603_v37  ;;  %v644_v2 = vadd.f32 %v636_v39, %v604_v50  ;;  %v605_v5 = vadd.f32 %v597_v42, %v565_v60  ;;  %v606_v24 = vadd.f32 %v598_v58, %v566_v17 }
 0x325   :  { %v665_v41 = vsel %vm341_vm4, %v652_v29, %v660_v33  ;;  %v669_v45 = vsel %vm341_vm4, %v660_v33, %v652_v29  ;;  %v626_v52 = vsel %vm289_vm2, %v614_v22, %v622_v9  ;;  %v630_v53 = vsel %vm289_vm2, %v622_v9, %v614_v22 }
 0x326   :  { %v675_v59 = vmul.f32 %v669_v45, %v1143_v54  ;;  %v676_v51 = vmul.f32 %v665_v41, %v1146_v55  ;;  %v637_v63 = vmul.f32 %v626_v52, %v1108_v4  ;;  %v638_v61 = vmul.f32 %v630_v53, %v1111_v8 }
 0x328   :  { %v662_v14 = vpop.permute.xlu0 %661  ;;  %v683_v46 = vadd.f32 %v675_v59, %v643_v20  ;;  %v684_v31 = vadd.f32 %v676_v51, %v644_v2  ;;  %v645_v3 = vadd.f32 %v637_v63, %v605_v5  ;;  %v646_v48 = vadd.f32 %v638_v61, %v606_v24 }
 0x329   :  { %v666_v18 = vsel %vm341_vm4, %v654_v27, %v662_v14  ;;  %v670_v62 = vsel %vm341_vm4, %v662_v14, %v654_v27 }
 0x32a   :  { %v677_v29 = vmul.f32 %v670_v62, %v1143_v54  ;;  %v678_v22 = vmul.f32 %v666_v18, %v1146_v55 }
 0x32c   :  { %v685_v4 = vadd.f32 %v677_v29, %v645_v3  ;;  %v686_v9 = vadd.f32 %v678_v22, %v646_v48 }
 0x331   :  { %v705_v28 = vpop.permute.xlu1 %704 }
 0x332   :  { %v716_v1 = vadd.f32 %v705_v28, %v683_v46  ;;  %v717_v23 = vadd.f32 %v705_v28, %v684_v31 }
 0x334   :  { %v724_v27 = vmax.f32 %v716_v1, 0.0  ;;  %v725_v26 = vmax.f32 %v717_v23, 0.0 }
 0x335   :  { %v710_v8 = vpop.permute.xlu0 %709 }
 0x336   :  { %v732_v13 = vmul.f32 0.1, %v724_v27  ;;  %v733_v19 = vmul.f32 0.1, %v725_v26  ;;  %v718_v32 = vadd.f32 %v710_v8, %v685_v4  ;;  %v719_v30 = vadd.f32 %v710_v8, %v686_v9 }
 0x338   :  { %v740_v54 = vadd.f32 %v732_v13, %v1268_v16  ;;  %v741_v55 = vadd.f32 %v733_v19, %v1265_v15  ;;  %v726_v38 = vmax.f32 %v718_v32, 0.0  ;;  %v727_v7 = vmax.f32 %v719_v30, 0.0 }
 0x33a   :  { %748 = vst [vmem:[#allocation7 + $0x20] sm:$0xff] %v740_v54  ;;  %749 = vst [vmem:[#allocation7 + $0x28] sm:$0xff] %v741_v55  ;;  %v734_v36 = vmul.f32 0.1, %v726_v38  ;;  %v735_v10 = vmul.f32 0.1, %v727_v7 }
 0x33c   :  { %v742_v33 = vadd.f32 %v734_v36, %v1262_v56  ;;  %v743_v57 = vadd.f32 %v735_v10, %v1259_v44 }
 0x33e   :  { %750 = vst [vmem:[#allocation7 + $0x30] sm:$0xff] %v742_v33  ;;  %751 = vst [vmem:[#allocation7 + $0x38] sm:$0xff] %v743_v57 }
 0x33f   :  { %850 = shalt.err (!%p847_p0)
}
 0x340   :  { %s875_s8 = smov 256  }
 0x341   :  { %763 = dma.vmem_to_hbm [thread:$0]  %s758_s6, 1024, %s1511_s4, [#allocation4], %s875_s8, %s875_s8, %s872_s20  }
 0x342   :  { %863 = dma.done.wait [#allocation4], 1024  }
 0x343   :  { %864 = vsyncadd [#allocation4], 4294966272 }
 0x344   :  { %767 = vsyncpa [#allocation3], 1 }
 0x345   :  { %768 = vsyncpa [#allocation6], 1 }
 0x346   :  { %769 = vsyncpa [#allocation4], 1 }

</bundles_post_ra>
